<compile_context>
chip_gen: v7x
topology: tpu7x:2x2x1
jax: 0.10.0
libtpu: 0.0.40
codegen_flags: <defaults>
</compile_context>

<pallas_src>
import functools

import jax
import jax.numpy as jnp
import numpy as np
from jax.experimental import pallas as pl
from jax.experimental.pallas import tpu as pltpu

EPS = 1e-5


def _mish(v):
    # Mish(x) = x * tanh(softplus(x)) = x * t / (t + 2), t = e^x (e^x + 2).
    # Clamp the exponent; for x > 20 the ratio equals 1 to ~1e-17.
    e = jnp.exp(jnp.minimum(v, 20.0))
    t = e * (e + 2.0)
    return v * (t / (t + 2.0))


def _dot(a, b):
    return jnp.dot(a, b, preferred_element_type=jnp.float32)


def _conv3(xf, mfirst, mlast, w_ref, b_row, cdt):
    """kernel_size=3, padding=1 Conv1d on a (rows, C_in) slab (rows batch-major,
    time-minor).  xf is f32; taps are built with pltpu.roll on the sublane axis
    and zeroed at per-batch time boundaries with the iota-derived masks.
    w_ref: (3, C_in, C_out); tap 0 multiplies x[t-1], tap 1 x[t], tap 2 x[t+1]."""
    rows = xf.shape[0]
    x_m1 = (pltpu.roll(xf, shift=1, axis=0) * mfirst).astype(cdt)        # x[t-1]
    x_p1 = (pltpu.roll(xf, shift=rows - 1, axis=0) * mlast).astype(cdt)  # x[t+1]
    y = _dot(x_m1, w_ref[0])
    y = y + _dot(xf.astype(cdt), w_ref[1])
    y = y + _dot(x_p1, w_ref[2])
    return y + b_row


def _groupnorm(y, r, rt, mc, mct, gamma, beta, inv_n):
    """GroupNorm (PyTorch semantics, biased variance) on a (rows, C) slab with
    the affine folded into one per-batch (scale, offset) pair, broadcast to
    rows with a single rt matmul.  r: (Bb, rows), rt: (rows, Bb) row<->batch
    0/1 membership; mc: (C, G), mct: (G, C) channel<->group 0/1 membership."""
    C = y.shape[-1]
    sum_b = _dot(r, y)                                   # (Bb, C)
    sq_b = _dot(r, y * y)                                # (Bb, C)
    mean_g = _dot(sum_b, mc) * inv_n                     # (Bb, G)
    msq_g = _dot(sq_b, mc) * inv_n                       # (Bb, G)
    # NOTE: single-pass E[x^2]-E[x]^2 with clamp; switch to a shifted/two-pass
    # form if post-conv activations ever develop mean >> std.
    var_g = jnp.maximum(msq_g - mean_g * mean_g, 0.0)
    rstd_g = jax.lax.rsqrt(var_g + EPS)
    mean_c = _dot(mean_g, mct)                           # (Bb, C)
    rstd_c = _dot(rstd_g, mct)                           # (Bb, C)
    a_b = rstd_c * gamma                                 # folded scale
    o_b = beta - mean_c * a_b                            # folded offset
    ab_r = _dot(rt, jnp.concatenate([a_b, o_b], axis=-1))   # (rows, 2C)
    return y * ab_r[:, :C] + ab_r[:, C:]


def _cond_res_block_kernel(cdt, inv_n, horizon, fuse_conv1, has_res, *refs):
    if has_res:
        (x_ref, sb_ref, w1_ref, w2_ref, wres_ref, vecs_ref,
         mc_ref, mct_ref, r_ref, rt_ref, o_ref) = refs
    else:
        (x_ref, sb_ref, w1_ref, w2_ref, vecs_ref,
         mc_ref, mct_ref, r_ref, rt_ref, o_ref) = refs

    x = x_ref[...]                                       # (rows, C_in), cdt
    rows = x.shape[0]
    C_out = o_ref.shape[-1]
    r = r_ref[...]
    rt = rt_ref[...]
    mc = mc_ref[...]
    mct = mct_ref[...]
    vecs = vecs_ref[...]                                 # (8, C_out) f32
    b1, g1, be1 = vecs[0:1], vecs[1:2], vecs[2:3]
    b2, g2, be2 = vecs[3:4], vecs[4:5], vecs[5:6]

    # Per-row conv boundary masks generated in-kernel (no DMA): rows are
    # batch-major / time-minor, so t = row % horizon.
    t_of_row = jax.lax.broadcasted_iota(jnp.int32, (rows, 1), 0) % horizon
    mfirst = (t_of_row != 0).astype(jnp.float32)         # zeros x[t-1] at t==0
    mlast = (t_of_row != horizon - 1).astype(jnp.float32)  # zeros x[t+1] at t==T-1

    xf = x.astype(jnp.float32)

    # ---- Conv1dBlock #1: Conv1d(k=3, pad=1) -> GroupNorm (folded) -> Mish ----
    if fuse_conv1:
        # Narrow C_in: fuse the three taps on the K axis -> one matmul.
        x_m1 = (pltpu.roll(xf, shift=1, axis=0) * mfirst).astype(cdt)
        x_p1 = (pltpu.roll(xf, shift=rows - 1, axis=0) * mlast).astype(cdt)
        xcat = jnp.concatenate([x_m1, x, x_p1], axis=-1)   # (rows, 3*C_in)
        y = _dot(xcat, w1_ref[...]) + b1
    else:
        y = _conv3(xf, mfirst, mlast, w1_ref, b1, cdt)
    y = _groupnorm(y, r, rt, mc, mct, g1, be1, inv_n)
    y = _mish(y)

    # ---- FiLM: one rt matmul on packed [scale | bias], one FMA ----
    sb_r = _dot(rt, sb_ref[...])                          # (rows, 2*C_out)
    y = sb_r[:, :C_out] * y + sb_r[:, C_out:]

    # ---- Conv1dBlock #2 ----
    y = _conv3(y, mfirst, mlast, w2_ref, b2, cdt)
    y = _groupnorm(y, r, rt, mc, mct, g2, be2, inv_n)
    y = _mish(y)

    # ---- residual: 1x1 conv, or identity (no matmul) when C_in == C_out ----
    if has_res:
        res = _dot(x, wres_ref[...]) + vecs[6:7]
        o_ref[...] = (y + res).astype(o_ref.dtype)
    else:
        o_ref[...] = (y + xf).astype(o_ref.dtype)


def _pick_batch_block(batch, horizon, max_rows, min_grid_steps=1):
    # Valid blocks: divisors d of batch with d == batch or d % 8 == 0 (sublane
    # tiling rule for the (d, 2*C_out) FiLM block).  Prefer the largest block
    # that fits max_rows AND leaves >= min_grid_steps grid steps (set
    # min_grid_steps=2 on v7x so both TensorCores get work).
    valid = [d for d in range(1, batch + 1)
             if batch % d == 0 and (d == batch or d % 8 == 0)]
    fitting = [d for d in valid
               if d * horizon <= max_rows and batch // d >= min_grid_steps]
    if fitting:
        return max(fitting)
    stepping = [d for d in valid if batch // d >= min_grid_steps]
    if stepping:
        return min(stepping)
    return min(valid)


def _round_up(v, m):
    return ((v + m - 1) // m) * m


def _padded_block_bytes(shape, dtype):
    s = list(shape)
    s[-1] = _round_up(s[-1], 128)
    s[-2] = _round_up(s[-2], 8)
    n = 1
    for d in s:
        n *= d
    return n * jnp.dtype(dtype).itemsize


def _estimate_vmem_limit_bytes(block_budget, rows, c_out):
    total = 0
    for shape, dtype in block_budget:
        total += 2 * _padded_block_bytes(shape, dtype)          # double-buffered
    total += 8 * _padded_block_bytes((rows, 2 * c_out), jnp.float32)  # live temps
    total = int(total * 1.25)
    return max(32 << 20, min(total, 100 << 20))


def cond_res_block_pallas(x, cond, params, n_groups, *,
                          compute_dtype=jnp.float32,
                          max_rows_per_step=1024,
                          min_grid_steps=1,
                          channels_last=False,
                          single_buffer_weights=False,
                          vmem_limit_bytes=None):
    """x: (B, C_in, T) (or (B, T, C_in) if channels_last), cond: (B, cond_dim)
    or None -> (B, C_out, T) float32 (or (B, T, C_out) if channels_last)."""
    if channels_last:
        B, T, C_in = x.shape
    else:
        B, C_in, T = x.shape
    C_out = params["b1"].shape[0]
    G = n_groups
    assert C_out % G == 0
    gsz = C_out // G
    cdt = compute_dtype
    has_res = "wres" in params
    if not has_res:
        assert C_in == C_out
    fuse_conv1 = C_in < 128

    B_blk = _pick_batch_block(B, T, max_rows_per_step, min_grid_steps)
    rows = B_blk * T
    grid = (B // B_blk,)

    # ---- FiLM conditioning: one batched XLA GEMM, hoisted out of the kernel;
    # kept packed as [scale | bias] (B, 2*C_out). ----
    if cond is not None:
        cm = cond * jnp.tanh(jax.nn.softplus(cond))
        sb = (cm @ params["wc"].T + params["bc"][None, :]).astype(jnp.float32)
    else:
        sb = jnp.concatenate([jnp.ones((B, C_out), jnp.float32),
                              jnp.zeros((B, C_out), jnp.float32)], axis=-1)

    # ---- kernel-friendly parameter layouts (channels-last) ----
    w1t = jnp.transpose(params["w1"], (2, 1, 0))                  # (3, C_in, C_out)
    w1k = (w1t.reshape(3 * C_in, C_out) if fuse_conv1 else w1t).astype(cdt)
    w2k = jnp.transpose(params["w2"], (2, 1, 0)).astype(cdt)      # (3, C_out, C_out)

    def rowv(v):
        return v.astype(jnp.float32)[None, :]

    zero_row = jnp.zeros((1, C_out), jnp.float32)
    vecs = jnp.concatenate([
        rowv(params["b1"]), rowv(params["gn1_w"]), rowv(params["gn1_b"]),
        rowv(params["b2"]), rowv(params["gn2_w"]), rowv(params["gn2_b"]),
        rowv(params["bres"]) if has_res else zero_row,
        zero_row], axis=0)                                        # (8, C_out)

    # ---- 0/1 membership matrices (precomputed, tiny) ----
    ch = np.arange(C_out)
    mc_np = (ch[:, None] // gsz == np.arange(G)[None, :]).astype(np.float32)
    b_of_row = np.arange(rows) // T
    r_np = (b_of_row[None, :] == np.arange(B_blk)[:, None]).astype(np.float32)
    mc = jnp.asarray(mc_np)          # (C_out, G)
    mct = jnp.asarray(mc_np.T)       # (G, C_out)
    r_m = jnp.asarray(r_np)          # (B_blk, rows)
    rt_m = jnp.asarray(r_np.T)       # (rows, B_blk)

    # channels-last activation rows, streamed in compute dtype
    if channels_last:
        x_rows = x.reshape(B * T, C_in).astype(cdt)
    else:
        x_rows = jnp.transpose(x, (0, 2, 1)).reshape(B * T, C_in).astype(cdt)
    # TODO(synk): keep activations channels-last across the whole UNet so the
    # (B, C, T) <-> rows transposes above/below disappear (one HBM pass each).

    def full(shape):
        idx = lambda b, _n=len(shape): (0,) * _n
        if single_buffer_weights:  # recommended on v7x (64 MiB VMEM)
            return pl.BlockSpec(shape, idx, pipeline_mode=pl.Buffered(1))
        return pl.BlockSpec(shape, idx)

    in_specs = [
        pl.BlockSpec((rows, C_in), lambda b: (b, 0)),             # x rows
        pl.BlockSpec((B_blk, 2 * C_out), lambda b: (b, 0)),       # FiLM [scale|bias]
        full(tuple(w1k.shape)),                                   # conv1 weight
        full((3, C_out, C_out)),                                  # conv2 weight
    ]
    args = [x_rows, sb, w1k, w2k]
    if has_res:
        wresk = jnp.transpose(params["wres"][:, :, 0]).astype(cdt)   # (C_in, C_out)
        in_specs.append(full((C_in, C_out)))
        args.append(wresk)
    in_specs += [full((8, C_out)),                                # packed vectors
                 full((C_out, G)), full((G, C_out)),              # channel<->group
                 full((B_blk, rows)), full((rows, B_blk))]        # row<->batch
    args += [vecs, mc, mct, r_m, rt_m]
    out_spec = pl.BlockSpec((rows, C_out), lambda b: (b, 0))

    if vmem_limit_bytes is None:
        block_budget = [((rows, C_in), cdt), ((B_blk, 2 * C_out), jnp.float32),
                        (tuple(w1k.shape), cdt), ((3, C_out, C_out), cdt),
                        ((8, C_out), jnp.float32), ((C_out, G), jnp.float32),
                        ((G, C_out), jnp.float32), ((B_blk, rows), jnp.float32),
                        ((rows, B_blk), jnp.float32), ((rows, C_out), jnp.float32)]
        if has_res:
            block_budget.append(((C_in, C_out), cdt))
        vmem_limit_bytes = _estimate_vmem_limit_bytes(block_budget, rows, C_out)

    kernel = functools.partial(_cond_res_block_kernel, cdt,
                               1.0 / float(gsz * T), T, fuse_conv1, has_res)

    out_rows = pl.pallas_call(
        kernel,
        out_shape=jax.ShapeDtypeStruct((B * T, C_out), jnp.float32),
        grid_spec=pltpu.PrefetchScalarGridSpec(
            num_scalar_prefetch=0,
            grid=grid,
            in_specs=in_specs,
            out_specs=out_spec,
        ),
        compiler_params=pltpu.CompilerParams(
            dimension_semantics=("parallel",),
            vmem_limit_bytes=int(vmem_limit_bytes)),
    )(*args)

    out = out_rows.reshape(B, T, C_out)
    return out if channels_last else jnp.transpose(out, (0, 2, 1))


# ---------------- pure-JAX reference (for validation only) ----------------
def cond_res_block_ref(x, cond, params, n_groups):
    def mish(v):
        return v * jnp.tanh(jax.nn.softplus(v))

    def conv3(inp, w, b):
        y = jax.lax.conv_general_dilated(
            inp, w, window_strides=(1,), padding=((1, 1),),
            dimension_numbers=("NCH", "OIH", "NCH"))
        return y + b[None, :, None]

    def gn(y, gamma, beta):
        Bb, C, T = y.shape
        yr = y.reshape(Bb, n_groups, C // n_groups, T)
        mean = yr.mean(axis=(2, 3), keepdims=True)
        var = yr.var(axis=(2, 3), keepdims=True)
        yn = ((yr - mean) / jnp.sqrt(var + EPS)).reshape(Bb, C, T)
        return yn * gamma[None, :, None] + beta[None, :, None]

    C_out = params["b1"].shape[0]
    out = conv3(x, params["w1"], params["b1"])
    out = mish(gn(out, params["gn1_w"], params["gn1_b"]))
    if cond is not None:
        embed = mish(cond) @ params["wc"].T + params["bc"][None, :]
        out = embed[:, :C_out, None] * out + embed[:, C_out:, None]
    out = conv3(out, params["w2"], params["b2"])
    out = mish(gn(out, params["gn2_w"], params["gn2_b"]))
    if "wres" in params:
        res = jnp.einsum("oc,bct->bot", params["wres"][:, :, 0], x) + \
            params["bres"][None, :, None]
    else:
        res = x
    return out + res


def _make_params(key, C_in, C_out, cond_dim, K, with_res):
    ks = jax.random.split(key, 12)
    p = {
        "w1": 0.3 * jax.random.normal(ks[0], (C_out, C_in, K), jnp.float32),
        "b1": 0.1 * jax.random.normal(ks[1], (C_out,), jnp.float32),
        "gn1_w": 1.0 + 0.1 * jax.random.normal(ks[2], (C_out,), jnp.float32),
        "gn1_b": 0.1 * jax.random.normal(ks[3], (C_out,), jnp.float32),
        "wc": 0.3 * jax.random.normal(ks[4], (2 * C_out, cond_dim), jnp.float32),
        "bc": 0.1 * jax.random.normal(ks[5], (2 * C_out,), jnp.float32),
        "w2": 0.3 * jax.random.normal(ks[6], (C_out, C_out, K), jnp.float32),
        "b2": 0.1 * jax.random.normal(ks[7], (C_out,), jnp.float32),
        "gn2_w": 1.0 + 0.1 * jax.random.normal(ks[8], (C_out,), jnp.float32),
        "gn2_b": 0.1 * jax.random.normal(ks[9], (C_out,), jnp.float32),
    }
    if with_res:
        p["wres"] = 0.3 * jax.random.normal(ks[10], (C_out, C_in, 1), jnp.float32)
        p["bres"] = 0.1 * jax.random.normal(ks[11], (C_out,), jnp.float32)
    return p


if __name__ == "__main__":
    B, C_in, C_out, T, cond_dim, n_groups, K = 2, 4, 8, 16, 16, 4, 3
    key = jax.random.PRNGKey(0)
    kp1, kp2, kx1, kx2, kc = jax.random.split(key, 5)

    # ---- case 1: in_channels != out_channels (1x1 residual conv) ----
    params1 = _make_params(kp1, C_in, C_out, cond_dim, K, with_res=True)
    x1 = jax.random.normal(kx1, (B, C_in, T), jnp.float32)
    cond = jax.random.normal(kc, (B, cond_dim), jnp.float32)

    ref1 = jax.block_until_ready(cond_res_block_ref(x1, cond, params1, n_groups))
    out1 = jax.block_until_ready(cond_res_block_pallas(x1, cond, params1, n_groups))
    assert out1.shape == (B, C_out, T), out1.shape
    np.testing.assert_allclose(np.asarray(out1), np.asarray(ref1),
                               atol=3e-3, rtol=3e-3)

    # bf16 matmul path (production config on v5e/v6e/v7x) -- tightened tolerance
    out1_bf16 = jax.block_until_ready(
        cond_res_block_pallas(x1, cond, params1, n_groups,
                              compute_dtype=jnp.bfloat16))
    np.testing.assert_allclose(np.asarray(out1_bf16), np.asarray(ref1),
                               atol=5e-2, rtol=5e-2)

    # ---- case 2: in_channels == out_channels (Identity residual, no matmul) ----
    params2 = _make_params(kp2, C_out, C_out, cond_dim, K, with_res=False)
    x2 = jax.random.normal(kx2, (B, C_out, T), jnp.float32)
    ref2 = jax.block_until_ready(cond_res_block_ref(x2, cond, params2, n_groups))
    out2 = jax.block_until_ready(cond_res_block_pallas(x2, cond, params2, n_groups))
    assert out2.shape == (B, C_out, T), out2.shape
    np.testing.assert_allclose(np.asarray(out2), np.asarray(ref2),
                               atol=3e-3, rtol=3e-3)

    print("KERNEL_OK")
</pallas_src>

<mosaic_0001>
module attributes {stable_mosaic.version = 11 : i64} {
  func.func @_cond_res_block_kernel(%arg0: i32, %arg1: memref<32x4xf32, #tpu.memory_space<vmem>>, %arg2: memref<2x16xf32, #tpu.memory_space<vmem>>, %arg3: memref<12x8xf32, #tpu.memory_space<vmem>>, %arg4: memref<3x8x8xf32, #tpu.memory_space<vmem>>, %arg5: memref<4x8xf32, #tpu.memory_space<vmem>>, %arg6: memref<8x8xf32, #tpu.memory_space<vmem>>, %arg7: memref<8x4xf32, #tpu.memory_space<vmem>>, %arg8: memref<4x8xf32, #tpu.memory_space<vmem>>, %arg9: memref<2x32xf32, #tpu.memory_space<vmem>>, %arg10: memref<32x2xf32, #tpu.memory_space<vmem>>, %arg11: memref<32x8xf32, #tpu.memory_space<vmem>>) attributes {dimension_semantics = [#tpu.dimension_semantics<parallel>], iteration_bounds = array<i64: 1>, scalar_prefetch = 0 : i64, scratch_operands = 0 : i64, tpu.core_type = #tpu.core_type<tc>, window_params = [{transform_indices = @transform_0, window_bounds = array<i64: 32, 4>}, {transform_indices = @transform_1, window_bounds = array<i64: 2, 16>}, {pipeline_mode = #tpu.pipeline_mode<synchronous>, transform_indices = @transform_2, window_bounds = array<i64: 12, 8>}, {pipeline_mode = #tpu.pipeline_mode<synchronous>, transform_indices = @transform_3, window_bounds = array<i64: 3, 8, 8>}, {pipeline_mode = #tpu.pipeline_mode<synchronous>, transform_indices = @transform_4, window_bounds = array<i64: 4, 8>}, {pipeline_mode = #tpu.pipeline_mode<synchronous>, transform_indices = @transform_5, window_bounds = array<i64: 8, 8>}, {pipeline_mode = #tpu.pipeline_mode<synchronous>, transform_indices = @transform_6, window_bounds = array<i64: 8, 4>}, {pipeline_mode = #tpu.pipeline_mode<synchronous>, transform_indices = @transform_7, window_bounds = array<i64: 4, 8>}, {pipeline_mode = #tpu.pipeline_mode<synchronous>, transform_indices = @transform_8, window_bounds = array<i64: 2, 32>}, {pipeline_mode = #tpu.pipeline_mode<synchronous>, transform_indices = @transform_9, window_bounds = array<i64: 32, 2>}, {transform_indices = @transform_10, window_bounds = array<i64: 32, 8>}]} {
    %c0 = arith.constant 0 : index
    %c0_0 = arith.constant 0 : index
    %0 = vector.load %arg1[%c0, %c0_0] : memref<32x4xf32, #tpu.memory_space<vmem>>, vector<32x4xf32>
    %c0_1 = arith.constant 0 : index
    %c0_2 = arith.constant 0 : index
    %1 = vector.load %arg9[%c0_1, %c0_2] : memref<2x32xf32, #tpu.memory_space<vmem>>, vector<2x32xf32>
    %c0_3 = arith.constant 0 : index
    %c0_4 = arith.constant 0 : index
    %2 = vector.load %arg10[%c0_3, %c0_4] : memref<32x2xf32, #tpu.memory_space<vmem>>, vector<32x2xf32>
    %c0_5 = arith.constant 0 : index
    %c0_6 = arith.constant 0 : index
    %3 = vector.load %arg7[%c0_5, %c0_6] : memref<8x4xf32, #tpu.memory_space<vmem>>, vector<8x4xf32>
    %c0_7 = arith.constant 0 : index
    %c0_8 = arith.constant 0 : index
    %4 = vector.load %arg8[%c0_7, %c0_8] : memref<4x8xf32, #tpu.memory_space<vmem>>, vector<4x8xf32>
    %c0_9 = arith.constant 0 : index
    %c0_10 = arith.constant 0 : index
    %5 = vector.load %arg6[%c0_9, %c0_10] : memref<8x8xf32, #tpu.memory_space<vmem>>, vector<8x8xf32>
    %6 = vector.extract_strided_slice %5 {offsets = [0, 0], sizes = [1, 8], strides = [1, 1]} : vector<8x8xf32> to vector<1x8xf32>
    %7 = vector.extract_strided_slice %5 {offsets = [1, 0], sizes = [1, 8], strides = [1, 1]} : vector<8x8xf32> to vector<1x8xf32>
    %8 = vector.extract_strided_slice %5 {offsets = [2, 0], sizes = [1, 8], strides = [1, 1]} : vector<8x8xf32> to vector<1x8xf32>
    %9 = vector.extract_strided_slice %5 {offsets = [3, 0], sizes = [1, 8], strides = [1, 1]} : vector<8x8xf32> to vector<1x8xf32>
    %10 = vector.extract_strided_slice %5 {offsets = [4, 0], sizes = [1, 8], strides = [1, 1]} : vector<8x8xf32> to vector<1x8xf32>
    %11 = vector.extract_strided_slice %5 {offsets = [5, 0], sizes = [1, 8], strides = [1, 1]} : vector<8x8xf32> to vector<1x8xf32>
    %12 = tpu.iota {dimensions = array<i32: 0>} : vector<32x1xi32>
    %c16_i32 = arith.constant 16 : i32
    %c0_i32 = arith.constant 0 : i32
    %13 = arith.cmpi eq, %c16_i32, %c0_i32 : i32
    %c1_i32 = arith.constant 1 : i32
    %14 = arith.select %13, %c1_i32, %c16_i32 : i32
    %15 = vector.broadcast %14 : i32 to vector<32x1xi32>
    %16 = arith.remsi %12, %15 : vector<32x1xi32>
    %c0_i32_11 = arith.constant 0 : i32
    %17 = vector.broadcast %c0_i32_11 : i32 to vector<32x1xi32>
    %18 = arith.cmpi ne, %16, %17 : vector<32x1xi32>
    %c0_i32_12 = arith.constant 0 : i32
    %19 = vector.broadcast %c0_i32_12 : i32 to vector<32x1xi32>
    %20 = arith.cmpi slt, %16, %19 : vector<32x1xi32>
    %c0_i32_13 = arith.constant 0 : i32
    %21 = arith.cmpi slt, %14, %c0_i32_13 : i32
    %22 = vector.broadcast %21 : i1 to vector<32x1xi1>
    %23 = vector.broadcast %22 : vector<32x1xi1> to vector<32x1xi1>
    %24 = arith.xori %20, %23 : vector<32x1xi1>
    %25 = arith.andi %24, %18 : vector<32x1xi1>
    %26 = vector.broadcast %14 : i32 to vector<32x1xi32>
    %27 = arith.addi %16, %26 : vector<32x1xi32>
    %28 = arith.select %25, %27, %16 : vector<32x1xi1>, vector<32x1xi32>
    %c0_i32_14 = arith.constant 0 : i32
    %29 = vector.broadcast %c0_i32_14 : i32 to vector<32x1xi32>
    %30 = arith.cmpi ne, %28, %29 : vector<32x1xi32>
    %31 = arith.extui %30 : vector<32x1xi1> to vector<32x1xi32>
    %32 = arith.sitofp %31 : vector<32x1xi32> to vector<32x1xf32>
    %c15_i32 = arith.constant 15 : i32
    %33 = vector.broadcast %c15_i32 : i32 to vector<32x1xi32>
    %34 = arith.cmpi ne, %28, %33 : vector<32x1xi32>
    %35 = arith.extui %34 : vector<32x1xi1> to vector<32x1xi32>
    %36 = arith.sitofp %35 : vector<32x1xi32> to vector<32x1xf32>
    %c1_i32_15 = arith.constant 1 : i32
    %37 = tpu.dynamic_rotate %0 by %c1_i32_15 dim 0 : vector<32x4xf32>, i32 -> vector<32x4xf32>
    %38 = vector.broadcast %32 : vector<32x1xf32> to vector<32x4xf32>
    %39 = arith.mulf %37, %38 : vector<32x4xf32>
    %c31_i32 = arith.constant 31 : i32
    %40 = tpu.dynamic_rotate %0 by %c31_i32 dim 0 : vector<32x4xf32>, i32 -> vector<32x4xf32>
    %41 = vector.broadcast %36 : vector<32x1xf32> to vector<32x4xf32>
    %42 = arith.mulf %40, %41 : vector<32x4xf32>
    %43 = tpu.concatenate %39, %0, %42 in 1 : vector<32x4xf32>, vector<32x4xf32>, vector<32x4xf32> -> vector<32x12xf32>
    %c0_16 = arith.constant 0 : index
    %c0_17 = arith.constant 0 : index
    %44 = vector.load %arg3[%c0_16, %c0_17] : memref<12x8xf32, #tpu.memory_space<vmem>>, vector<12x8xf32>
    %cst = arith.constant dense<0.000000e+00> : vector<32x8xf32>
    %45 = tpu.matmul %43, %44, %cst {dimension_numbers = #tpu.dot_dimension_numbers<[1], [0], [0], [1], [0, 0, 1, 1], [], []>} : vector<32x12xf32>, vector<12x8xf32>, vector<32x8xf32> -> vector<32x8xf32>
    %46 = vector.broadcast %6 : vector<1x8xf32> to vector<32x8xf32>
    %47 = arith.addf %45, %46 : vector<32x8xf32>
    %cst_18 = arith.constant dense<0.000000e+00> : vector<2x8xf32>
    %48 = tpu.matmul %1, %47, %cst_18 {dimension_numbers = #tpu.dot_dimension_numbers<[1], [0], [0], [1], [0, 0, 1, 1], [], []>} : vector<2x32xf32>, vector<32x8xf32>, vector<2x8xf32> -> vector<2x8xf32>
    %49 = arith.mulf %47, %47 : vector<32x8xf32>
    %cst_19 = arith.constant dense<0.000000e+00> : vector<2x8xf32>
    %50 = tpu.matmul %1, %49, %cst_19 {dimension_numbers = #tpu.dot_dimension_numbers<[1], [0], [0], [1], [0, 0, 1, 1], [], []>} : vector<2x32xf32>, vector<32x8xf32>, vector<2x8xf32> -> vector<2x8xf32>
    %cst_20 = arith.constant dense<0.000000e+00> : vector<2x4xf32>
    %51 = tpu.matmul %48, %3, %cst_20 {dimension_numbers = #tpu.dot_dimension_numbers<[1], [0], [0], [1], [0, 0, 1, 1], [], []>} : vector<2x8xf32>, vector<8x4xf32>, vector<2x4xf32> -> vector<2x4xf32>
    %cst_21 = arith.constant 3.125000e-02 : f32
    %52 = vector.broadcast %cst_21 : f32 to vector<2x4xf32>
    %53 = arith.mulf %51, %52 : vector<2x4xf32>
    %cst_22 = arith.constant dense<0.000000e+00> : vector<2x4xf32>
    %54 = tpu.matmul %50, %3, %cst_22 {dimension_numbers = #tpu.dot_dimension_numbers<[1], [0], [0], [1], [0, 0, 1, 1], [], []>} : vector<2x8xf32>, vector<8x4xf32>, vector<2x4xf32> -> vector<2x4xf32>
    %cst_23 = arith.constant 3.125000e-02 : f32
    %55 = vector.broadcast %cst_23 : f32 to vector<2x4xf32>
    %56 = arith.mulf %54, %55 : vector<2x4xf32>
    %57 = arith.mulf %53, %53 : vector<2x4xf32>
    %58 = arith.subf %56, %57 : vector<2x4xf32>
    %cst_24 = arith.constant 0.000000e+00 : f32
    %59 = vector.broadcast %cst_24 : f32 to vector<2x4xf32>
    %60 = arith.maximumf %58, %59 : vector<2x4xf32>
    %cst_25 = arith.constant 9.99999974E-6 : f32
    %61 = vector.broadcast %cst_25 : f32 to vector<2x4xf32>
    %62 = arith.addf %60, %61 : vector<2x4xf32>
    %63 = math.rsqrt %62 : vector<2x4xf32>
    %cst_26 = arith.constant dense<0.000000e+00> : vector<2x8xf32>
    %64 = tpu.matmul %53, %4, %cst_26 {dimension_numbers = #tpu.dot_dimension_numbers<[1], [0], [0], [1], [0, 0, 1, 1], [], []>} : vector<2x4xf32>, vector<4x8xf32>, vector<2x8xf32> -> vector<2x8xf32>
    %cst_27 = arith.constant dense<0.000000e+00> : vector<2x8xf32>
    %65 = tpu.matmul %63, %4, %cst_27 {dimension_numbers = #tpu.dot_dimension_numbers<[1], [0], [0], [1], [0, 0, 1, 1], [], []>} : vector<2x4xf32>, vector<4x8xf32>, vector<2x8xf32> -> vector<2x8xf32>
    %66 = vector.broadcast %7 : vector<1x8xf32> to vector<2x8xf32>
    %67 = arith.mulf %65, %66 : vector<2x8xf32>
    %68 = arith.mulf %64, %67 : vector<2x8xf32>
    %69 = vector.broadcast %8 : vector<1x8xf32> to vector<2x8xf32>
    %70 = arith.subf %69, %68 : vector<2x8xf32>
    %71 = tpu.concatenate %67, %70 in 1 : vector<2x8xf32>, vector<2x8xf32> -> vector<2x16xf32>
    %cst_28 = arith.constant dense<0.000000e+00> : vector<32x16xf32>
    %72 = tpu.matmul %2, %71, %cst_28 {dimension_numbers = #tpu.dot_dimension_numbers<[1], [0], [0], [1], [0, 0, 1, 1], [], []>} : vector<32x2xf32>, vector<2x16xf32>, vector<32x16xf32> -> vector<32x16xf32>
    %73 = vector.extract_strided_slice %72 {offsets = [0, 0], sizes = [32, 8], strides = [1, 1]} : vector<32x16xf32> to vector<32x8xf32>
    %74 = arith.mulf %47, %73 : vector<32x8xf32>
    %75 = vector.extract_strided_slice %72 {offsets = [0, 8], sizes = [32, 8], strides = [1, 1]} : vector<32x16xf32> to vector<32x8xf32>
    %76 = arith.addf %74, %75 : vector<32x8xf32>
    %cst_29 = arith.constant 2.000000e+01 : f32
    %77 = vector.broadcast %cst_29 : f32 to vector<32x8xf32>
    %78 = arith.minimumf %76, %77 : vector<32x8xf32>
    %79 = math.exp %78 : vector<32x8xf32>
    %cst_30 = arith.constant 2.000000e+00 : f32
    %80 = vector.broadcast %cst_30 : f32 to vector<32x8xf32>
    %81 = arith.addf %79, %80 : vector<32x8xf32>
    %82 = arith.mulf %79, %81 : vector<32x8xf32>
    %cst_31 = arith.constant 2.000000e+00 : f32
    %83 = vector.broadcast %cst_31 : f32 to vector<32x8xf32>
    %84 = arith.addf %82, %83 : vector<32x8xf32>
    %85 = arith.divf %82, %84 : vector<32x8xf32>
    %86 = arith.mulf %76, %85 : vector<32x8xf32>
    %c0_32 = arith.constant 0 : index
    %c0_33 = arith.constant 0 : index
    %87 = vector.load %arg2[%c0_32, %c0_33] : memref<2x16xf32, #tpu.memory_space<vmem>>, vector<2x16xf32>
    %cst_34 = arith.constant dense<0.000000e+00> : vector<32x16xf32>
    %88 = tpu.matmul %2, %87, %cst_34 {dimension_numbers = #tpu.dot_dimension_numbers<[1], [0], [0], [1], [0, 0, 1, 1], [], []>} : vector<32x2xf32>, vector<2x16xf32>, vector<32x16xf32> -> vector<32x16xf32>
    %89 = vector.extract_strided_slice %88 {offsets = [0, 0], sizes = [32, 8], strides = [1, 1]} : vector<32x16xf32> to vector<32x8xf32>
    %90 = arith.mulf %89, %86 : vector<32x8xf32>
    %91 = vector.extract_strided_slice %88 {offsets = [0, 8], sizes = [32, 8], strides = [1, 1]} : vector<32x16xf32> to vector<32x8xf32>
    %92 = arith.addf %90, %91 : vector<32x8xf32>
    %c1_i32_35 = arith.constant 1 : i32
    %93 = tpu.dynamic_rotate %92 by %c1_i32_35 dim 0 : vector<32x8xf32>, i32 -> vector<32x8xf32>
    %94 = vector.broadcast %32 : vector<32x1xf32> to vector<32x8xf32>
    %95 = arith.mulf %93, %94 : vector<32x8xf32>
    %c31_i32_36 = arith.constant 31 : i32
    %96 = tpu.dynamic_rotate %92 by %c31_i32_36 dim 0 : vector<32x8xf32>, i32 -> vector<32x8xf32>
    %97 = vector.broadcast %36 : vector<32x1xf32> to vector<32x8xf32>
    %98 = arith.mulf %96, %97 : vector<32x8xf32>
    %c0_37 = arith.constant 0 : index
    %c0_38 = arith.constant 0 : index
    %c0_39 = arith.constant 0 : index
    %99 = vector.load %arg4[%c0_37, %c0_38, %c0_39] : memref<3x8x8xf32, #tpu.memory_space<vmem>>, vector<1x8x8xf32>
    %100 = vector.shape_cast %99 : vector<1x8x8xf32> to vector<8x8xf32>
    %cst_40 = arith.constant dense<0.000000e+00> : vector<32x8xf32>
    %101 = tpu.matmul %95, %100, %cst_40 {dimension_numbers = #tpu.dot_dimension_numbers<[1], [0], [0], [1], [0, 0, 1, 1], [], []>} : vector<32x8xf32>, vector<8x8xf32>, vector<32x8xf32> -> vector<32x8xf32>
    %c1 = arith.constant 1 : index
    %c0_41 = arith.constant 0 : index
    %c0_42 = arith.constant 0 : index
    %102 = vector.load %arg4[%c1, %c0_41, %c0_42] : memref<3x8x8xf32, #tpu.memory_space<vmem>>, vector<1x8x8xf32>
    %103 = vector.shape_cast %102 : vector<1x8x8xf32> to vector<8x8xf32>
    %cst_43 = arith.constant dense<0.000000e+00> : vector<32x8xf32>
    %104 = tpu.matmul %92, %103, %cst_43 {dimension_numbers = #tpu.dot_dimension_numbers<[1], [0], [0], [1], [0, 0, 1, 1], [], []>} : vector<32x8xf32>, vector<8x8xf32>, vector<32x8xf32> -> vector<32x8xf32>
    %105 = arith.addf %101, %104 : vector<32x8xf32>
    %c2 = arith.constant 2 : index
    %c0_44 = arith.constant 0 : index
    %c0_45 = arith.constant 0 : index
    %106 = vector.load %arg4[%c2, %c0_44, %c0_45] : memref<3x8x8xf32, #tpu.memory_space<vmem>>, vector<1x8x8xf32>
    %107 = vector.shape_cast %106 : vector<1x8x8xf32> to vector<8x8xf32>
    %cst_46 = arith.constant dense<0.000000e+00> : vector<32x8xf32>
    %108 = tpu.matmul %98, %107, %cst_46 {dimension_numbers = #tpu.dot_dimension_numbers<[1], [0], [0], [1], [0, 0, 1, 1], [], []>} : vector<32x8xf32>, vector<8x8xf32>, vector<32x8xf32> -> vector<32x8xf32>
    %109 = arith.addf %105, %108 : vector<32x8xf32>
    %110 = vector.broadcast %9 : vector<1x8xf32> to vector<32x8xf32>
    %111 = arith.addf %109, %110 : vector<32x8xf32>
    %cst_47 = arith.constant dense<0.000000e+00> : vector<2x8xf32>
    %112 = tpu.matmul %1, %111, %cst_47 {dimension_numbers = #tpu.dot_dimension_numbers<[1], [0], [0], [1], [0, 0, 1, 1], [], []>} : vector<2x32xf32>, vector<32x8xf32>, vector<2x8xf32> -> vector<2x8xf32>
    %113 = arith.mulf %111, %111 : vector<32x8xf32>
    %cst_48 = arith.constant dense<0.000000e+00> : vector<2x8xf32>
    %114 = tpu.matmul %1, %113, %cst_48 {dimension_numbers = #tpu.dot_dimension_numbers<[1], [0], [0], [1], [0, 0, 1, 1], [], []>} : vector<2x32xf32>, vector<32x8xf32>, vector<2x8xf32> -> vector<2x8xf32>
    %cst_49 = arith.constant dense<0.000000e+00> : vector<2x4xf32>
    %115 = tpu.matmul %112, %3, %cst_49 {dimension_numbers = #tpu.dot_dimension_numbers<[1], [0], [0], [1], [0, 0, 1, 1], [], []>} : vector<2x8xf32>, vector<8x4xf32>, vector<2x4xf32> -> vector<2x4xf32>
    %cst_50 = arith.constant 3.125000e-02 : f32
    %116 = vector.broadcast %cst_50 : f32 to vector<2x4xf32>
    %117 = arith.mulf %115, %116 : vector<2x4xf32>
    %cst_51 = arith.constant dense<0.000000e+00> : vector<2x4xf32>
    %118 = tpu.matmul %114, %3, %cst_51 {dimension_numbers = #tpu.dot_dimension_numbers<[1], [0], [0], [1], [0, 0, 1, 1], [], []>} : vector<2x8xf32>, vector<8x4xf32>, vector<2x4xf32> -> vector<2x4xf32>
    %cst_52 = arith.constant 3.125000e-02 : f32
    %119 = vector.broadcast %cst_52 : f32 to vector<2x4xf32>
    %120 = arith.mulf %118, %119 : vector<2x4xf32>
    %121 = arith.mulf %117, %117 : vector<2x4xf32>
    %122 = arith.subf %120, %121 : vector<2x4xf32>
    %cst_53 = arith.constant 0.000000e+00 : f32
    %123 = vector.broadcast %cst_53 : f32 to vector<2x4xf32>
    %124 = arith.maximumf %122, %123 : vector<2x4xf32>
    %cst_54 = arith.constant 9.99999974E-6 : f32
    %125 = vector.broadcast %cst_54 : f32 to vector<2x4xf32>
    %126 = arith.addf %124, %125 : vector<2x4xf32>
    %127 = math.rsqrt %126 : vector<2x4xf32>
    %cst_55 = arith.constant dense<0.000000e+00> : vector<2x8xf32>
    %128 = tpu.matmul %117, %4, %cst_55 {dimension_numbers = #tpu.dot_dimension_numbers<[1], [0], [0], [1], [0, 0, 1, 1], [], []>} : vector<2x4xf32>, vector<4x8xf32>, vector<2x8xf32> -> vector<2x8xf32>
    %cst_56 = arith.constant dense<0.000000e+00> : vector<2x8xf32>
    %129 = tpu.matmul %127, %4, %cst_56 {dimension_numbers = #tpu.dot_dimension_numbers<[1], [0], [0], [1], [0, 0, 1, 1], [], []>} : vector<2x4xf32>, vector<4x8xf32>, vector<2x8xf32> -> vector<2x8xf32>
    %130 = vector.broadcast %10 : vector<1x8xf32> to vector<2x8xf32>
    %131 = arith.mulf %129, %130 : vector<2x8xf32>
    %132 = arith.mulf %128, %131 : vector<2x8xf32>
    %133 = vector.broadcast %11 : vector<1x8xf32> to vector<2x8xf32>
    %134 = arith.subf %133, %132 : vector<2x8xf32>
    %135 = tpu.concatenate %131, %134 in 1 : vector<2x8xf32>, vector<2x8xf32> -> vector<2x16xf32>
    %cst_57 = arith.constant dense<0.000000e+00> : vector<32x16xf32>
    %136 = tpu.matmul %2, %135, %cst_57 {dimension_numbers = #tpu.dot_dimension_numbers<[1], [0], [0], [1], [0, 0, 1, 1], [], []>} : vector<32x2xf32>, vector<2x16xf32>, vector<32x16xf32> -> vector<32x16xf32>
    %137 = vector.extract_strided_slice %136 {offsets = [0, 0], sizes = [32, 8], strides = [1, 1]} : vector<32x16xf32> to vector<32x8xf32>
    %138 = arith.mulf %111, %137 : vector<32x8xf32>
    %139 = vector.extract_strided_slice %136 {offsets = [0, 8], sizes = [32, 8], strides = [1, 1]} : vector<32x16xf32> to vector<32x8xf32>
    %140 = arith.addf %138, %139 : vector<32x8xf32>
    %cst_58 = arith.constant 2.000000e+01 : f32
    %141 = vector.broadcast %cst_58 : f32 to vector<32x8xf32>
    %142 = arith.minimumf %140, %141 : vector<32x8xf32>
    %143 = math.exp %142 : vector<32x8xf32>
    %cst_59 = arith.constant 2.000000e+00 : f32
    %144 = vector.broadcast %cst_59 : f32 to vector<32x8xf32>
    %145 = arith.addf %143, %144 : vector<32x8xf32>
    %146 = arith.mulf %143, %145 : vector<32x8xf32>
    %cst_60 = arith.constant 2.000000e+00 : f32
    %147 = vector.broadcast %cst_60 : f32 to vector<32x8xf32>
    %148 = arith.addf %146, %147 : vector<32x8xf32>
    %149 = arith.divf %146, %148 : vector<32x8xf32>
    %150 = arith.mulf %140, %149 : vector<32x8xf32>
    %c0_61 = arith.constant 0 : index
    %c0_62 = arith.constant 0 : index
    %151 = vector.load %arg5[%c0_61, %c0_62] : memref<4x8xf32, #tpu.memory_space<vmem>>, vector<4x8xf32>
    %cst_63 = arith.constant dense<0.000000e+00> : vector<32x8xf32>
    %152 = tpu.matmul %0, %151, %cst_63 {dimension_numbers = #tpu.dot_dimension_numbers<[1], [0], [0], [1], [0, 0, 1, 1], [], []>} : vector<32x4xf32>, vector<4x8xf32>, vector<32x8xf32> -> vector<32x8xf32>
    %153 = vector.extract_strided_slice %5 {offsets = [6, 0], sizes = [1, 8], strides = [1, 1]} : vector<8x8xf32> to vector<1x8xf32>
    %154 = vector.broadcast %153 : vector<1x8xf32> to vector<32x8xf32>
    %155 = arith.addf %152, %154 : vector<32x8xf32>
    %156 = arith.addf %150, %155 : vector<32x8xf32>
    %c0_64 = arith.constant 0 : index
    %c0_65 = arith.constant 0 : index
    %157 = vector.load %arg11[%c0_64, %c0_65] : memref<32x8xf32, #tpu.memory_space<vmem>>, vector<32x8xf32>
    tpu.vector_store %arg11[%c0_64, %c0_65], %156 {strides = array<i32>} : memref<32x8xf32, #tpu.memory_space<vmem>>, vector<32x8xf32>,
    return
  }
  func.func @transform_0(%arg0: i32) -> (i32, i32) {
    %c0_i32 = arith.constant 0 : i32
    %c0_i32_0 = arith.constant 0 : i32
    return %arg0, %c0_i32 : i32, i32
  }
  func.func @transform_1(%arg0: i32) -> (i32, i32) {
    %c0_i32 = arith.constant 0 : i32
    %c0_i32_0 = arith.constant 0 : i32
    return %arg0, %c0_i32 : i32, i32
  }
  func.func @transform_2(%arg0: i32) -> (i32, i32) {
    %c0_i32 = arith.constant 0 : i32
    %c0_i32_0 = arith.constant 0 : i32
    %c0_i32_1 = arith.constant 0 : i32
    return %c0_i32, %c0_i32_0 : i32, i32
  }
  func.func @transform_3(%arg0: i32) -> (i32, i32, i32) {
    %c0_i32 = arith.constant 0 : i32
    %c0_i32_0 = arith.constant 0 : i32
    %c0_i32_1 = arith.constant 0 : i32
    %c0_i32_2 = arith.constant 0 : i32
    return %c0_i32, %c0_i32_0, %c0_i32_1 : i32, i32, i32
  }
  func.func @transform_4(%arg0: i32) -> (i32, i32) {
    %c0_i32 = arith.constant 0 : i32
    %c0_i32_0 = arith.constant 0 : i32
    %c0_i32_1 = arith.constant 0 : i32
    return %c0_i32, %c0_i32_0 : i32, i32
  }
  func.func @transform_5(%arg0: i32) -> (i32, i32) {
    %c0_i32 = arith.constant 0 : i32
    %c0_i32_0 = arith.constant 0 : i32
    %c0_i32_1 = arith.constant 0 : i32
    return %c0_i32, %c0_i32_0 : i32, i32
  }
  func.func @transform_6(%arg0: i32) -> (i32, i32) {
    %c0_i32 = arith.constant 0 : i32
    %c0_i32_0 = arith.constant 0 : i32
    %c0_i32_1 = arith.constant 0 : i32
    return %c0_i32, %c0_i32_0 : i32, i32
  }
  func.func @transform_7(%arg0: i32) -> (i32, i32) {
    %c0_i32 = arith.constant 0 : i32
    %c0_i32_0 = arith.constant 0 : i32
    %c0_i32_1 = arith.constant 0 : i32
    return %c0_i32, %c0_i32_0 : i32, i32
  }
  func.func @transform_8(%arg0: i32) -> (i32, i32) {
    %c0_i32 = arith.constant 0 : i32
    %c0_i32_0 = arith.constant 0 : i32
    %c0_i32_1 = arith.constant 0 : i32
    return %c0_i32, %c0_i32_0 : i32, i32
  }
  func.func @transform_9(%arg0: i32) -> (i32, i32) {
    %c0_i32 = arith.constant 0 : i32
    %c0_i32_0 = arith.constant 0 : i32
    %c0_i32_1 = arith.constant 0 : i32
    return %c0_i32, %c0_i32_0 : i32, i32
  }
  func.func @transform_10(%arg0: i32) -> (i32, i32) {
    %c0_i32 = arith.constant 0 : i32
    %c0_i32_0 = arith.constant 0 : i32
    return %arg0, %c0_i32 : i32, i32
  }
}

</mosaic_0001>

<bundles_post_ra>
// kernel: tpu_custom_call.1
= control target key start
LH: loop header
LB: loop body
LE: loop exit
PB: predicated region body
PF: predicated region fallthrough
CT: control target
= control target key end

     0   :  { %v47_v0 = vlaneseq  ;;  %s2460_s19 = smov 4   ;;  %vm211_vm0 = vcmask 1043456   ;;  %s2461_s25 = smov 8   ;;  %vm2462_vm2 = vmmov 1   ;;  %v2463_v19 = vmov 0.0   ;;  %s2933_s0 = inlined_call_operand.vmem [shape: f32[32,4], index: 0, kind: input, shape index: {}]   ;;  %s2934_s2 = inlined_call_operand.vmem [shape: f32[12,8], index: 2, kind: input, shape index: {}]   ;;  %s2935_s5 = inlined_call_operand.vmem [shape: f32[8,8], index: 5, kind: input, shape index: {}]   ;;  %s2936_s8 = inlined_call_operand.vmem [shape: f32[2,32], index: 8, kind: input, shape index: {}]   ;;  %s2937_s6 = inlined_call_operand.vmem [shape: f32[8,4], index: 6, kind: input, shape index: {}]   ;;  %s2938_s7 = inlined_call_operand.vmem [shape: f32[4,8], index: 7, kind: input, shape index: {}]   ;;  %s2939_s9 = inlined_call_operand.vmem [shape: f32[32,2], index: 9, kind: input, shape index: {}]   ;;  %s2940_s1 = inlined_call_operand.vmem [shape: f32[2,16], index: 1, kind: input, shape index: {}]   ;;  %s2941_s3 = inlined_call_operand.vmem [shape: f32[3,8,8], index: 3, kind: input, shape index: {}]   ;;  %s2942_s4 = inlined_call_operand.vmem [shape: f32[4,8], index: 4, kind: input, shape index: {}]   ;;  %s2943_s10 = inlined_call_operand.vmem [shape: f32[32,8], index: 10, kind: output, shape index: {}]  }
   0x1   :  { %v2525_v1 = vld [vmem:[%s2933_s0 + $0x18] sm:$0xff]  ;;  %v2530_v2 = vld [vmem:[%s2933_s0] sm:$0xff]  ;;  %v2535_v3 = vld [vmem:[%s2933_s0 + $0x8] sm:$0xff]  ;;  %vm182_vm8 = vcmask 31744   ;;  %vm187_vm9 = vcmask 64512   ;;  %vm198_vm11 = vcmask 97280  }
   0x2   :  { %160 = vrot.lane.b32.xlu1 %v2525_v1, %s2460_s19  ;;  %154 = vrot.lane.b32.xlu0 %v2530_v2, %s2460_s19  ;;  %v2541_v4 = vshrl.u32 %v47_v0, 7  ;;  %v2546_v5 = vld [vmem:[%s2933_s0 + $0x10] sm:$0xff]  ;;  %v137_v6 = vrot.slane %v2530_v2, 1  ;;  %v138_v7 = vrot.slane %v2535_v3, 1  ;;  %v140_v12 = vrot.slane %v2525_v1, 1  ;;  %v192_v13 = vld [vmem:[%s2934_s2] sm:$0xff]  ;;  %vm2380_vm3 = vmpackc.low %vm211_vm0, %vm2462_vm2 }
   0x3   :  { %v139_v8 = vrot.slane %v2546_v5, 1  ;;  %v193_v14 = vld [vmem:[%s2934_s2 + $0x8] sm:$0xf]  ;;  %v127_v27 = vrot.slane %v2525_v1, 7  ;;  %v124_v28 = vrot.slane %v2530_v2, 7  ;;  %v125_v36 = vrot.slane %v2535_v3, 7 }
   0x4   :  { %vm141_vm1 = vcmp.lt.s32.totalorder %v2541_v4, 7  ;;  %v49_v9 = vadd.s32 8, %v2541_v4  ;;  %v51_v10 = vadd.s32 24, %v2541_v4  ;;  %v2379_v18 = vpack.c.bf16 %v193_v14, %v192_v13  ;;  %v2631_v59 = vld [vmem:[%s2935_s5] sm:$0xff] }
   0x5   :  { %v144_v11 = vsel %vm141_vm1, %v137_v6, %v138_v7  ;;  %v143_v17 = vsel %vm141_vm1, %v138_v7, %v139_v8  ;;  %v145_v22 = vsel %vm141_vm1, %v140_v12, %v137_v6  ;;  %v142_v24 = vsel %vm141_vm1, %v139_v8, %v140_v12 }
   0x6   :  { %156 = vrot.lane.b32.xlu0 %v2535_v3, %s2460_s19  ;;  %170 = vrot.lane.b32.xlu1 %v144_v11, %s2461_s25  ;;  %v63_v15 = vand.u32 15, %v49_v9  ;;  %v77_v16 = vand.u32 15, %v51_v10  ;;  %v56_v26 = vand.u32 15, %v2541_v4  ;;  %vm128_vm6 = vcmp.lt.s32.totalorder %v2541_v4, 1 }
   0x7   :  { %2381 = vmatprep.subr.msk.bf16.mxu0 %vm2380_vm3, %v2379_v18  ;;  %v50_v29 = vadd.s32 16, %v2541_v4  ;;  %v132_v31 = vsel %vm128_vm6, %v127_v27, %v124_v28  ;;  %v126_v37 = vrot.slane %v2546_v5, 7  ;;  %v131_v44 = vsel %vm128_vm6, %v124_v28, %v125_v36 }
   0x8   :  { %vm113_vm4 = vcmp.ne.s32.totalorder %v63_v15, 15  ;;  %vm115_vm5 = vcmp.ne.s32.totalorder %v77_v16, 15  ;;  %2384 = vmatpush3.bf16.msk.msra.mxu0 %vm2380_vm3, %v2379_v18  ;;  %vm100_vm7 = vcmp.ne.s32.totalorder %v56_v26, 0  ;;  %v2464_v57 = vmov 0.0|0.0   ;;  %v2659_v18 = vld [vmem:[%s2936_s8] sm:$0x3] }
   0x9   :  { %v2570_v20 = vsel %vm113_vm4, 1.0, %v2463_v19  ;;  %v2573_v21 = vsel %vm115_vm5, 1.0, %v2463_v19  ;;  %v2592_v30 = vsel %vm100_vm7, 1.0, %v2463_v19  ;;  %v70_v32 = vand.u32 15, %v50_v29  ;;  %2385 = vmatprep.subr.bf16.mxu1 %v2464_v57  ;;  %2391 = vmatprep.subr.bf16.mxu0 %v2464_v57 }
   0xa   :  { %158 = vrot.lane.b32.xlu0 %v2546_v5, %s2460_s19  ;;  %v147_v23 = vmul.f32 %v2570_v20, %v143_v17  ;;  %v149_v25 = vmul.f32 %v2573_v21, %v145_v22  ;;  %v133_v35 = vmul.f32 %v2592_v30, %v132_v31  ;;  %v130_v43 = vsel %vm128_vm6, %v125_v36, %v126_v37  ;;  %v2674_v22 = vld [vmem:[%s2937_s6] sm:$0xff] }
   0xb   :  { %vm102_vm10 = vcmp.ne.s32.totalorder %v70_v32, 0  ;;  %v129_v49 = vsel %vm128_vm6, %v126_v37, %v127_v27  ;;  %vm2465_vm12 = vmmov 0   ;;  %v196_v58 = vsub.s32 0, %v2541_v4  ;;  %v2689_v27 = vld [vmem:[%s2938_s7] sm:$0xf] }
   0xc   :  { %172 = vrot.lane.b32.xlu1 %v147_v23, %s2461_s25  ;;  %v2602_v42 = vsel %vm102_vm10, 1.0, %v2463_v19  ;;  %2247 = vmatprep.mubr.msk.f32.mxu1 %vm2465_vm12, %v2463_v19  ;;  %vm300_vm13 = vcmask 261120   ;;  %vm766_vm14 = vcmask 15360   ;;  %vm779_vm15 = vcmask 1041408  }
   0xd   :  { %v135_v45 = vmul.f32 %v2602_v42, %v130_v43  ;;  %v197_v60 = vrot.slane %v2631_v59, %v196_v58  ;;  %v752_v43 = vsub.s32 1, %v2541_v4 }
   0xe   :  { %174 = vrot.lane.b32.xlu0 %v142_v24, %s2461_s25 }
  0x10   :  { %176 = vrot.lane.b32.xlu1 %v149_v25, %s2461_s25 }
  0x74   :  { %v161_v33 = vpop.permute.xlu1 %160  ;;  %v155_v34 = vpop.permute.xlu0 %154 }
  0x75   :  { %v183_v38 = vsel %vm182_vm8, %v133_v35, %v155_v34  ;;  %v186_v54 = vsel %vm182_vm8, %v129_v49, %v161_v33 }
  0x78   :  { %v157_v39 = vpop.permute.xlu0 %156  ;;  %v171_v40 = vpop.permute.xlu1 %170 }
  0x79   :  { %v188_v41 = vsel %vm187_vm9, %v183_v38, %v171_v40  ;;  %v184_v47 = vsel %vm182_vm8, %v131_v44, %v157_v39  ;;  %v2701_v44 = vld [vmem:[%s2939_s9] sm:$0xff] }
  0x7a   :  { %2233 = vmatprep.mubr.msk.f32.mxu0 %vm198_vm11, %v188_v41 }
  0x7c   :  { %v159_v46 = vpop.permute.xlu0 %158 }
  0x7d   :  { %v185_v51 = vsel %vm182_vm8, %v135_v45, %v159_v46  ;;  %v753_v45 = vrot.slane %v2631_v59, %v752_v43  ;;  %v758_v46 = vsub.s32 2, %v2541_v4 }
  0x7e   :  { %v173_v48 = vpop.permute.xlu1 %172 }
  0x7f   :  { %v189_v50 = vsel %vm187_vm9, %v184_v47, %v173_v48 }
  0x80   :  { %v175_v52 = vpop.permute.xlu0 %174  ;;  %2234 = vmatmul.mubr.msk.f32.vlgmr.msra.gmra.mrb[0].mxu0 %vm198_vm11, %v189_v50  ;;  %v759_v50 = vrot.slane %v2631_v59, %v758_v46 }
  0x81   :  { %v190_v53 = vsel %vm187_vm9, %v185_v51, %v175_v52  ;;  %v928_v51 = vld [vmem:[%s2940_s1] sm:$0x3] }
  0x82   :  { %v177_v55 = vpop.permute.xlu1 %176  ;;  %2236 = vmatprep.mubr.msk.f32.mxu0 %vm198_vm11, %v190_v53  ;;  %v2717_v53 = vld [vmem:[%s2939_s9 + $0x8] sm:$0xff] }
  0x83   :  { %v191_v56 = vsel %vm187_vm9, %v186_v54, %v177_v55  ;;  %v2723_v55 = vld [vmem:[%s2939_s9 + $0x10] sm:$0xff] }
  0x84   :  { %2237 = vmatmul.mubr.msk.f32.gmra.mrb[2].mxu0 %vm198_vm11, %v191_v56  ;;  %v2734_v56 = vld [vmem:[%s2939_s9 + $0x18] sm:$0xff]  ;;  %s2466_s9 = smov 120  }
  0x85   :  { %2258 = vmatprep.mubr.msk.f32.mxu0 %vm2465_vm12, %v2463_v19 }
 0x153   :  { %v2235_v61 = vpop.f32.mrb[0].mxu0 }
 0x154   :  { %v2634_v62 = vadd.f32 %v2235_v61, %v197_v60  ;;  %v281_v63 = vpop.f32.mrb[1].mxu0 }
 0x155   :  { %v2636_v0 = vadd.f32 %v281_v63, %v197_v60 }
 0x156   :  { %v375_v6 = vmul.f32 %v2634_v62, %v2634_v62 }
 0x157   :  { %v374_v7 = vmul.f32 %v2636_v0, %v2636_v0  ;;  %v2238_v8 = vpop.f32.mrb[2].mxu0  ;;  %v2386_v9 = vpack.c.bf16 %v2634_v62, %v2636_v0 }
 0x158   :  { %v2644_v10 = vadd.f32 %v2238_v8, %v197_v60  ;;  %v291_v11 = vpop.f32.mrb[3].mxu0 }
 0x159   :  { %v2392_v12 = vpack.c.bf16 %v375_v6, %v374_v7  ;;  %v2646_v13 = vadd.f32 %v291_v11, %v197_v60  ;;  %2387 = vmatpush3.bf16.msra.mxu1 %v2386_v9 }
 0x15a   :  { %v377_v14 = vmul.f32 %v2644_v10, %v2644_v10  ;;  %2388 = vmatprep.subr.bf16.mxu1 %v2464_v57 }
 0x15b   :  { %v376_v15 = vmul.f32 %v2646_v13, %v2646_v13  ;;  %2393 = vmatpush3.bf16.msra.mxu0 %v2392_v12  ;;  %v2389_v16 = vpack.c.bf16 %v2644_v10, %v2646_v13 }
 0x15c   :  { %2394 = vmatprep.subr.bf16.mxu0 %v2464_v57 }
 0x15d   :  { %v2395_v17 = vpack.c.bf16 %v377_v14, %v376_v15  ;;  %2390 = vmatpush3.bf16.msra.mxu1 %v2389_v16  ;;  %v2120_v14 = vld [vmem:[%s2941_s3 + $0x8] sm:$0xff]  ;;  %v2775_v15 = vld [vmem:[%s2941_s3] sm:$0xff] }
 0x15e   :  { %2261 = vmatprep.subr.mxu1 %v2463_v19 }
 0x15f   :  { %2396 = vmatpush3.bf16.msra.mxu0 %v2395_v17 }
 0x160   :  { %2248 = vmatmul.mubr.msk.f32.vlgmr.msra.gmra.mrb[0].mxu1 %vm300_vm13, %v2659_v18  ;;  %2266 = vmatprep.subr.mxu0 %v2463_v19 }
 0x161   :  { %2263 = vmatprep.mubr.msk.f32.mxu1 %vm2465_vm12, %v2463_v19  ;;  %2262 = vmatpush3.msra.mxu1 %v2674_v22 }
 0x162   :  { %2259 = vmatmul.mubr.msk.f32.vlgmr.msra.gmra.mrb[4].mxu0 %vm300_vm13, %v2659_v18  ;;  %2271 = vmatprep.subr.mxu1 %v2463_v19 }
 0x163   :  { %2268 = vmatprep.mubr.msk.f32.mxu0 %vm2465_vm12, %v2463_v19  ;;  %2267 = vmatpush3.msra.mxu0 %v2674_v22 }
 0x164   :  { %2276 = vmatprep.subr.mxu0 %v2463_v19 }
 0x233   :  { %v370_v23 = vpop.f32.mrb[0].mxu1 }
 0x234   :  { %v2249_v24 = vpop.f32.mrb[1].mxu1  ;;  %2264 = vmatmul.mubr.msk.f32.vlgmr.msra.gmra.mrb[2].mxu1 %vm187_vm9, %v370_v23 }
 0x235   :  { %v444_v25 = vpop.f32.mrb[4].mxu0  ;;  %2273 = vmatprep.mubr.msk.f32.mxu1 %vm2465_vm12, %v2463_v19  ;;  %2272 = vmatpush3.msk.msra.mxu1 %vm211_vm0, %v2689_v27 }
 0x236   :  { %v2260_v26 = vpop.f32.mrb[5].mxu0  ;;  %2269 = vmatmul.mubr.msk.f32.vlgmr.msra.gmra.mrb[6].mxu0 %vm187_vm9, %v444_v25 }
 0x237   :  { %2278 = vmatprep.mubr.msk.f32.mxu0 %vm2465_vm12, %v2463_v19  ;;  %2277 = vmatpush3.msk.msra.mxu0 %vm211_vm0, %v2689_v27 }
 0x238   :  { %2289 = vmatprep.subr.msk.mxu0 %vm779_vm15, %v928_v51 }
 0x307   :  { %v517_v28 = vpop.f32.mrb[2].mxu1 }
 0x308   :  { %v521_v29 = vmul.f32 0.03125, %v517_v28  ;;  %v2265_v31 = vpop.f32.mrb[3].mxu1 }
 0x309   :  { %v591_v32 = vpop.f32.mrb[6].mxu0 }
 0x30a   :  { %v596_v33 = vmul.f32 %v521_v29, %v521_v29  ;;  %v595_v34 = vmul.f32 0.03125, %v591_v32  ;;  %v2270_v35 = vpop.f32.mrb[7].mxu0  ;;  %2274 = vmatmul.mubr.msk.f32.vlgmr.msra.gmra.mrb[4].mxu1 %vm182_vm8, %v521_v29 }
 0x30b   :  { %2283 = vmatprep.mubr.msk.f32.mxu1 %vm766_vm14, %v2701_v44 }
 0x30c   :  { %v597_v36 = vsub.f32 %v595_v34, %v596_v33 }
 0x30e   :  { %v598_v37 = vmax.f32 %v597_v36, 0.0 }
 0x310   :  { %v599_v38 = vadd.f32 1e-05, %v598_v37 }
 0x312   :  { %2424 = vrsqrt.f32 %v599_v38 }
 0x31c   :  { %v2425_v39 = vpop.eup %2424 }
 0x31d   :  { %2279 = vmatmul.mubr.msk.f32.vlgmr.msra.gmra.mrb[8].mxu0 %vm182_vm8, %v2425_v39 }
 0x31e   :  { %2291 = vmatprep.mubr.msk.f32.mxu0 %vm766_vm14, %v2701_v44  ;;  %2290 = vmatpush3.msk.msra.mxu0 %vm779_vm15, %v928_v51 }
 0x31f   :  { %2397 = vmatprep.subr.bf16.mxu0 %v2464_v57 }
 0x321   :  { %2292 = vmatmul.mubr.msk.f32.vlgmr.msra.gmra.mrb[10].mxu0 %vm766_vm14, %v2717_v53 }
 0x322   :  { %2294 = vmatprep.mubr.msk.f32.mxu0 %vm766_vm14, %v2723_v55 }
 0x325   :  { %2295 = vmatmul.mubr.msk.f32.gmra.mrb[12].mxu0 %vm766_vm14, %v2734_v56 }
 0x326   :  { %2329 = vmatprep.mubr.msk.f32.mxu0 %vm2465_vm12, %v2463_v19 }
 0x3dd   :  { %v673_v40 = vpop.f32.mrb[4].mxu1 }
 0x3de   :  { %v2275_v41 = vpop.f32.mrb[5].mxu1 }
 0x3f0   :  { %v746_v47 = vpop.f32.mrb[8].mxu0 }
 0x3f1   :  { %v754_v48 = vmul.f32 %v753_v45, %v746_v47  ;;  %v2280_v49 = vpop.f32.mrb[9].mxu0 }
 0x3f3   :  { %v755_v52 = vmul.f32 %v754_v48, %v673_v40 }
 0x3f4   :  { %v2749_v61 = vpop.f32.mrb[10].mxu0 }
 0x3f5   :  { %v760_v54 = vsub.f32 %v759_v50, %v755_v52  ;;  %v2751_v63 = vpop.f32.mrb[11].mxu0 }
 0x3f7   :  { %762 = vrot.lane.b32.xlu0 %v760_v54, %s2461_s25 }
 0x3f8   :  { %v2753_v6 = vpop.f32.mrb[12].mxu0 }
 0x3f9   :  { %v2755_v7 = vpop.f32.mrb[13].mxu0 }
 0x469   :  { %v763_v58 = vpop.permute.xlu0 %762 }
 0x46a   :  { %v765_v60 = vsel %vm187_vm9, %v754_v48, %v763_v58 }
 0x46b   :  { %2281 = vmatprep.subr.msk.mxu1 %vm779_vm15, %v765_v60 }
 0x46c   :  { %2282 = vmatpush3.msk.msra.mxu1 %vm779_vm15, %v765_v60 }
 0x46d   :  { %2284 = vmatmul.mubr.msk.f32.vlgmr.msra.gmra.mrb[6].mxu1 %vm766_vm14, %v2717_v53  ;;  %2297 = vmatprep.subr.mxu1 %v2120_v14 }
 0x46e   :  { %2286 = vmatprep.mubr.msk.f32.mxu1 %vm766_vm14, %v2723_v55  ;;  %2298 = vmatpush3.msra.mxu1 %v2120_v14 }
 0x46f   :  { %2305 = vmatprep.subr.mxu1 %v2775_v15 }
 0x471   :  { %2287 = vmatmul.mubr.msk.f32.gmra.mrb[8].mxu1 %vm766_vm14, %v2734_v56 }
 0x540   :  { %v2285_v8 = vpop.f32.mrb[6].mxu1 }
 0x541   :  { %878 = vrot.lane.b32.xlu0 %v2285_v8, %s2466_s9  ;;  %v849_v9 = vpop.f32.mrb[7].mxu1  ;;  %v869_v16 = vmul.f32 %v2285_v8, %v2634_v62 }
 0x542   :  { %876 = vrot.lane.b32.xlu1 %v849_v9, %s2466_s9  ;;  %v868_v17 = vmul.f32 %v849_v9, %v2636_v0 }
 0x544   :  { %v2288_v11 = vpop.f32.mrb[8].mxu1 }
 0x545   :  { %v859_v12 = vpop.f32.mrb[9].mxu1  ;;  %v871_v29 = vmul.f32 %v2288_v11, %v2644_v10 }
 0x546   :  { %882 = vrot.lane.b32.xlu1 %v2288_v11, %s2466_s9  ;;  %880 = vrot.lane.b32.xlu0 %v859_v12, %s2466_s9  ;;  %v870_v31 = vmul.f32 %v859_v12, %v2646_v13 }
 0x54a   :  { %1025 = vrot.lane.b32.xlu1 %v2751_v63, %s2466_s9  ;;  %1027 = vrot.lane.b32.xlu0 %v2749_v61, %s2466_s9 }
 0x54e   :  { %1031 = vrot.lane.b32.xlu1 %v2753_v6, %s2466_s9  ;;  %1029 = vrot.lane.b32.xlu0 %v2755_v7, %s2466_s9 }
 0x5b3   :  { %v879_v23 = vpop.permute.xlu0 %878 }
 0x5b4   :  { %v889_v24 = vadd.f32 %v879_v23, %v869_v16  ;;  %v877_v25 = vpop.permute.xlu1 %876 }
 0x5b5   :  { %v888_v26 = vadd.f32 %v877_v25, %v868_v17 }
 0x5b6   :  { %v893_v28 = vmin.f32 %v889_v24, 20.0 }
 0x5b7   :  { %v892_v32 = vmin.f32 %v888_v26, 20.0 }
 0x5b8   :  { %v898_v33 = vmul.f32 1.442695, %v893_v28  ;;  %v883_v34 = vpop.permute.xlu1 %882  ;;  %v881_v35 = vpop.permute.xlu0 %880 }
 0x5b9   :  { %v896_v36 = vmul.f32 1.442695, %v892_v32  ;;  %v891_v37 = vadd.f32 %v883_v34, %v871_v29  ;;  %v890_v38 = vadd.f32 %v881_v35, %v870_v31 }
 0x5ba   :  { %2426 = vpow2.f32 %v898_v33 }
 0x5bb   :  { %2428 = vpow2.f32 %v896_v36  ;;  %v895_v62 = vmin.f32 %v891_v37, 20.0  ;;  %v894_v0 = vmin.f32 %v890_v38, 20.0 }
 0x5bc   :  { %v1026_v17 = vpop.permute.xlu1 %1025  ;;  %v1028_v25 = vpop.permute.xlu0 %1027 }
 0x5bd   :  { %v902_v39 = vmul.f32 1.442695, %v895_v62  ;;  %v900_v40 = vmul.f32 1.442695, %v894_v0 }
 0x5bf   :  { %2430 = vpow2.f32 %v902_v39 }
 0x5c0   :  { %2432 = vpow2.f32 %v900_v40 }
 0x5c4   :  { %v2427_v41 = vpop.eup %2426 }
 0x5c5   :  { %v2429_v43 = vpop.eup %2428  ;;  %v905_v10 = vadd.f32 2.0, %v2427_v41 }
 0x5c6   :  { %v904_v45 = vadd.f32 2.0, %v2429_v43 }
 0x5c7   :  { %v909_v13 = vmul.f32 %v2427_v41, %v905_v10  ;;  %v1032_v41 = vpop.permute.xlu1 %1031  ;;  %v1030_v10 = vpop.permute.xlu0 %1029 }
 0x5c8   :  { %v908_v46 = vmul.f32 %v2429_v43, %v904_v45 }
 0x5c9   :  { %v2431_v47 = vpop.eup %2430  ;;  %v913_v48 = vadd.f32 2.0, %v909_v13 }
 0x5ca   :  { %v2433_v49 = vpop.eup %2432  ;;  %v912_v50 = vadd.f32 2.0, %v908_v46  ;;  %v907_v51 = vadd.f32 2.0, %v2431_v47 }
 0x5cb   :  { %2434 = vrcp.f32 %v913_v48  ;;  %v906_v52 = vadd.f32 2.0, %v2433_v49 }
 0x5cc   :  { %2436 = vrcp.f32 %v912_v50  ;;  %v911_v54 = vmul.f32 %v2431_v47, %v907_v51 }
 0x5cd   :  { %v910_v58 = vmul.f32 %v2433_v49, %v906_v52 }
 0x5ce   :  { %v915_v60 = vadd.f32 2.0, %v911_v54 }
 0x5cf   :  { %v914_v8 = vadd.f32 2.0, %v910_v58 }
 0x5d0   :  { %2438 = vrcp.f32 %v915_v60  ;;  %v1367_v60 = vsub.s32 3, %v2541_v4 }
 0x5d1   :  { %2440 = vrcp.f32 %v914_v8 }
 0x5d2   :  { %v1368_v8 = vrot.slane %v2631_v59, %v1367_v60 }
 0x5d5   :  { %v2435_v9 = vpop.eup %2434 }
 0x5d6   :  { %v2437_v11 = vpop.eup %2436  ;;  %v919_v12 = vmul.f32 %v2435_v9, %v909_v13 }
 0x5d7   :  { %v917_v14 = vmul.f32 %v2437_v11, %v908_v46 }
 0x5d8   :  { %v925_v16 = vmul.f32 %v919_v12, %v889_v24 }
 0x5d9   :  { %v924_v23 = vmul.f32 %v917_v14, %v888_v26 }
 0x5da   :  { %v2439_v28 = vpop.eup %2438  ;;  %v1018_v29 = vmul.f32 %v2749_v61, %v925_v16  ;;  %v2129_v61 = vld [vmem:[%s2941_s3 + $0x10] sm:$0xff] }
 0x5db   :  { %v2441_v31 = vpop.eup %2440  ;;  %v923_v32 = vmul.f32 %v2439_v28, %v911_v54  ;;  %v1017_v33 = vmul.f32 %v2751_v63, %v924_v23 }
 0x5dc   :  { %v921_v34 = vmul.f32 %v2441_v31, %v910_v58  ;;  %v1038_v35 = vadd.f32 %v1028_v25, %v1018_v29 }
 0x5dd   :  { %v927_v36 = vmul.f32 %v923_v32, %v891_v37  ;;  %v1037_v62 = vadd.f32 %v1026_v17, %v1017_v33 }
 0x5de   :  { %v926_v0 = vmul.f32 %v921_v34, %v890_v38  ;;  %v1042_v39 = vrot.slane %v1038_v35, 7  ;;  %v1054_v40 = vrot.slane %v1038_v35, 1 }
 0x5df   :  { %v1041_v43 = vrot.slane %v1037_v62, 7  ;;  %v1053_v24 = vrot.slane %v1037_v62, 1  ;;  %2299 = vmatprep.mubr.msk.f32.mxu1 %vm187_vm9, %v1037_v62  ;;  %v1020_v26 = vmul.f32 %v2753_v6, %v927_v36 }
 0x5e0   :  { %2300 = vmatmul.mubr.msk.f32.vlgmr.msra.gmra.mrb[10].mxu1 %vm187_vm9, %v1038_v35  ;;  %v1019_v63 = vmul.f32 %v2755_v7, %v926_v0 }
 0x5e1   :  { %v1040_v37 = vadd.f32 %v1032_v41, %v1020_v26  ;;  %2306 = vmatpush3.msra.mxu1 %v2775_v15  ;;  %v1047_v38 = vsel %vm128_vm6, %v1041_v43, %v1042_v39  ;;  %v1059_v45 = vsel %vm141_vm1, %v1053_v24, %v1054_v40 }
 0x5e2   :  { %v1039_v13 = vadd.f32 %v1030_v10, %v1019_v63  ;;  %2313 = vmatprep.subr.mxu1 %v2129_v61  ;;  %v1818_v63 = vsub.s32 4, %v2541_v4 }
 0x5e3   :  { %v1044_v6 = vrot.slane %v1040_v37, 7  ;;  %v1056_v46 = vrot.slane %v1040_v37, 1 }
 0x5e4   :  { %v1043_v47 = vrot.slane %v1039_v13, 7  ;;  %v1055_v48 = vrot.slane %v1039_v13, 1  ;;  %2302 = vmatprep.mubr.msk.f32.mxu1 %vm187_vm9, %v1039_v13 }
 0x5e5   :  { %2303 = vmatmul.mubr.msk.f32.gmra.mrb[12].mxu1 %vm187_vm9, %v1040_v37  ;;  %v1048_v7 = vsel %vm128_vm6, %v1044_v6, %v1041_v43  ;;  %v1060_v15 = vsel %vm141_vm1, %v1056_v46, %v1053_v24  ;;  %v1824_v37 = vsub.s32 5, %v2541_v4 }
 0x5e6   :  { %v1058_v49 = vsel %vm141_vm1, %v1054_v40, %v1055_v48  ;;  %v1049_v50 = vmul.f32 %v2592_v30, %v1048_v7  ;;  %v1046_v51 = vsel %vm128_vm6, %v1042_v39, %v1043_v47  ;;  %v1045_v52 = vsel %vm128_vm6, %v1043_v47, %v1044_v6 }
 0x5e7   :  { %v1057_v54 = vsel %vm141_vm1, %v1055_v48, %v1056_v46  ;;  %v1051_v58 = vmul.f32 %v2602_v42, %v1046_v51  ;;  %v1062_v30 = vmul.f32 %v2570_v20, %v1058_v49  ;;  %v1064_v42 = vmul.f32 %v2573_v21, %v1060_v15  ;;  %v1980_v46 = vld [vmem:[%s2942_s4] sm:$0xf] }
 0x5e8   :  { %2307 = vmatprep.mubr.msk.f32.mxu1 %vm187_vm9, %v1049_v50  ;;  %v1825_v6 = vrot.slane %v2631_v59, %v1824_v37 }
 0x5e9   :  { %2308 = vmatmul.mubr.msk.f32.vlgmr.msra.gmra.mrb[10].mxu1 %vm187_vm9, %v1047_v38 }
 0x5ea   :  { %2310 = vmatprep.mubr.msk.f32.mxu1 %vm187_vm9, %v1051_v58  ;;  %2314 = vmatpush3.msra.mxu1 %v2129_v61 }
 0x5eb   :  { %2358 = vmatprep.subr.mxu1 %v2463_v19 }
 0x5ed   :  { %2311 = vmatmul.mubr.msk.f32.gmra.mrb[12].mxu1 %vm187_vm9, %v1045_v52 }
 0x5ee   :  { %2315 = vmatprep.mubr.msk.f32.mxu1 %vm187_vm9, %v1059_v45 }
 0x5f1   :  { %2316 = vmatmul.mubr.msk.f32.vlgmr.msra.gmra.mrb[10].mxu1 %vm187_vm9, %v1062_v30 }
 0x5f2   :  { %2318 = vmatprep.mubr.msk.f32.mxu1 %vm187_vm9, %v1057_v54  ;;  %2359 = vmatpush3.msk.msra.mxu1 %vm211_vm0, %v2689_v27 }
 0x5f3   :  { %2371 = vmatprep.subr.msk.mxu1 %vm211_vm0, %v1980_v46 }
 0x5f5   :  { %2319 = vmatmul.mubr.msk.f32.gmra.mrb[12].mxu1 %vm187_vm9, %v1064_v42 }
 0x5f6   :  { %2360 = vmatprep.mubr.msk.f32.mxu1 %vm2465_vm12, %v2463_v19 }
 0x6c4   :  { %v2317_v9 = vpop.f32.mrb[10].mxu1 }
 0x6c5   :  { %v2829_v20 = vadd.f32 %v2317_v9, %v1368_v8  ;;  %v1342_v11 = vpop.f32.mrb[11].mxu1 }
 0x6c6   :  { %v2831_v12 = vadd.f32 %v1368_v8, %v1342_v11 }
 0x6c7   :  { %v1444_v25 = vmul.f32 %v2829_v20, %v2829_v20 }
 0x6c8   :  { %v2398_v14 = vpack.c.bf16 %v2829_v20, %v2831_v12  ;;  %v2320_v16 = vpop.f32.mrb[12].mxu1  ;;  %v1443_v28 = vmul.f32 %v2831_v12, %v2831_v12 }
 0x6c9   :  { %v2835_v21 = vadd.f32 %v2320_v16, %v1368_v8  ;;  %v1352_v17 = vpop.f32.mrb[13].mxu1 }
 0x6ca   :  { %v2837_v23 = vadd.f32 %v1368_v8, %v1352_v17  ;;  %2399 = vmatpush3.bf16.msra.mxu0 %v2398_v14  ;;  %v2404_v31 = vpack.c.bf16 %v1444_v25, %v1443_v28 }
 0x6cb   :  { %2400 = vmatprep.subr.bf16.mxu0 %v2464_v57  ;;  %v1446_v32 = vmul.f32 %v2835_v21, %v2835_v21 }
 0x6cc   :  { %v2401_v29 = vpack.c.bf16 %v2835_v21, %v2837_v23  ;;  %v1445_v33 = vmul.f32 %v2837_v23, %v2837_v23 }
 0x6ce   :  { %2402 = vmatpush3.bf16.msra.mxu0 %v2401_v29  ;;  %v2407_v34 = vpack.c.bf16 %v1446_v32, %v1445_v33 }
 0x6cf   :  { %2403 = vmatprep.subr.bf16.mxu0 %v2464_v57 }
 0x6d1   :  { %2330 = vmatmul.mubr.msk.f32.vlgmr.msra.gmra.mrb[14].mxu0 %vm300_vm13, %v2659_v18 }
 0x6d2   :  { %2405 = vmatpush3.bf16.msra.mxu0 %v2404_v31  ;;  %2340 = vmatprep.mubr.msk.f32.mxu0 %vm2465_vm12, %v2463_v19 }
 0x6d3   :  { %2406 = vmatprep.subr.bf16.mxu0 %v2464_v57 }
 0x6d6   :  { %2408 = vmatpush3.bf16.msra.mxu0 %v2407_v34 }
 0x6d7   :  { %2343 = vmatprep.subr.mxu0 %v2463_v19 }
 0x6d9   :  { %2341 = vmatmul.mubr.msk.f32.vlgmr.msra.gmra.mrb[16].mxu0 %vm300_vm13, %v2659_v18 }
 0x6da   :  { %2344 = vmatpush3.msra.mxu0 %v2674_v22  ;;  %2345 = vmatprep.mubr.msk.f32.mxu0 %vm2465_vm12, %v2463_v19 }
 0x6db   :  { %2348 = vmatprep.subr.mxu0 %v2463_v19 }
 0x7a4   :  { %v1439_v35 = vpop.f32.mrb[14].mxu0 }
 0x7a5   :  { %v2331_v36 = vpop.f32.mrb[15].mxu0  ;;  %2346 = vmatmul.mubr.msk.f32.vlgmr.msra.gmra.mrb[18].mxu0 %vm187_vm9, %v1439_v35 }
 0x7a6   :  { %2349 = vmatpush3.msra.mxu0 %v2674_v22  ;;  %2350 = vmatprep.mubr.msk.f32.mxu0 %vm2465_vm12, %v2463_v19 }
 0x7a7   :  { %2353 = vmatprep.subr.mxu0 %v2463_v19 }
 0x7ac   :  { %v1513_v57 = vpop.f32.mrb[16].mxu0 }
 0x7ad   :  { %v2342_v18 = vpop.f32.mrb[17].mxu0  ;;  %2351 = vmatmul.mubr.msk.f32.vlgmr.msra.gmra.mrb[20].mxu0 %vm187_vm9, %v1513_v57 }
 0x7ae   :  { %2354 = vmatpush3.msk.msra.mxu0 %vm211_vm0, %v2689_v27  ;;  %2355 = vmatprep.mubr.msk.f32.mxu0 %vm2465_vm12, %v2463_v19 }
 0x878   :  { %v1586_v62 = vpop.f32.mrb[18].mxu0 }
 0x879   :  { %v1590_v0 = vmul.f32 0.03125, %v1586_v62  ;;  %v2347_v39 = vpop.f32.mrb[19].mxu0 }
 0x87b   :  { %2356 = vmatmul.mubr.msk.f32.vlgmr.msra.gmra.mrb[22].mxu0 %vm182_vm8, %v1590_v0  ;;  %v1665_v40 = vmul.f32 %v1590_v0, %v1590_v0 }
 0x87c   :  { %2365 = vmatprep.mubr.msk.f32.mxu0 %vm766_vm14, %v2701_v44  ;;  %v1819_v44 = vrot.slane %v2631_v59, %v1818_v63 }
 0x880   :  { %v1660_v22 = vpop.f32.mrb[20].mxu0 }
 0x881   :  { %v1664_v41 = vmul.f32 0.03125, %v1660_v22  ;;  %v2352_v43 = vpop.f32.mrb[21].mxu0 }
 0x883   :  { %v1666_v24 = vsub.f32 %v1664_v41, %v1665_v40 }
 0x885   :  { %v1667_v26 = vmax.f32 %v1666_v24, 0.0  ;;  %v1983_v24 = vsub.s32 6, %v2541_v4 }
 0x887   :  { %v1668_v10 = vadd.f32 1e-05, %v1667_v26  ;;  %v1984_v26 = vrot.slane %v2631_v59, %v1983_v24 }
 0x889   :  { %2442 = vrsqrt.f32 %v1668_v10 }
 0x893   :  { %v2443_v27 = vpop.eup %2442 }
 0x894   :  { %2361 = vmatmul.mubr.msk.f32.vlgmr.msra.gmra.mrb[14].mxu1 %vm182_vm8, %v2443_v27 }
 0x895   :  { %2373 = vmatprep.mubr.msk.f32.mxu1 %vm182_vm8, %v2530_v2  ;;  %2372 = vmatpush3.msk.msra.mxu1 %vm211_vm0, %v1980_v46 }
 0x898   :  { %2374 = vmatmul.mubr.msk.f32.vlgmr.msra.gmra.mrb[16].mxu1 %vm182_vm8, %v2535_v3 }
 0x899   :  { %2376 = vmatprep.mubr.msk.f32.mxu1 %vm182_vm8, %v2546_v5 }
 0x89c   :  { %2377 = vmatmul.mubr.msk.f32.gmra.mrb[18].mxu1 %vm182_vm8, %v2525_v1 }
 0x94e   :  { %v1739_v19 = vpop.f32.mrb[22].mxu0 }
 0x94f   :  { %v2357_v61 = vpop.f32.mrb[23].mxu0 }
 0x967   :  { %v1812_v38 = vpop.f32.mrb[14].mxu1 }
 0x968   :  { %v1820_v45 = vmul.f32 %v1819_v44, %v1812_v38  ;;  %v2362_v13 = vpop.f32.mrb[15].mxu1 }
 0x96a   :  { %v1821_v47 = vmul.f32 %v1820_v45, %v1739_v19 }
 0x96b   :  { %v2375_v49 = vpop.f32.mrb[16].mxu1 }
 0x96c   :  { %v1826_v2 = vsub.f32 %v1825_v6, %v1821_v47  ;;  %v2068_v61 = vadd.f32 %v2375_v49, %v1984_v26 }
 0x96e   :  { %1828 = vrot.lane.b32.xlu1 %v1826_v2, %s2461_s25 }
 0x9e0   :  { %v1829_v48 = vpop.permute.xlu1 %1828 }
 0x9e1   :  { %v1831_v7 = vsel %vm187_vm9, %v1820_v45, %v1829_v48 }
 0x9e2   :  { %2363 = vmatprep.subr.msk.mxu0 %vm779_vm15, %v1831_v7 }
 0x9e3   :  { %2364 = vmatpush3.msk.msra.mxu0 %vm779_vm15, %v1831_v7 }
 0x9e4   :  { %2366 = vmatmul.mubr.msk.f32.vlgmr.msra.gmra.mrb[24].mxu0 %vm766_vm14, %v2717_v53  ;;  %v2062_v53 = vpop.f32.mrb[17].mxu1 }
 0x9e5   :  { %2368 = vmatprep.mubr.msk.f32.mxu0 %vm766_vm14, %v2723_v55  ;;  %v2378_v50 = vpop.f32.mrb[18].mxu1  ;;  %v2063_v44 = vadd.f32 %v2062_v53, %v1984_v26 }
 0x9e6   :  { %v2908_v51 = vpop.f32.mrb[19].mxu1  ;;  %v2078_v47 = vadd.f32 %v2378_v50, %v1984_v26 }
 0x9e7   :  { %v2073_v4 = vadd.f32 %v2908_v51, %v1984_v26 }
 0x9e8   :  { %2369 = vmatmul.mubr.msk.f32.gmra.mrb[26].mxu0 %vm766_vm14, %v2734_v56 }
 0xab7   :  { %v2367_v3 = vpop.f32.mrb[24].mxu0 }
 0xab8   :  { %1930 = vrot.lane.b32.xlu1 %v2367_v3, %s2466_s9  ;;  %v1901_v1 = vpop.f32.mrb[25].mxu0  ;;  %v1921_v55 = vmul.f32 %v2367_v3, %v2829_v20 }
 0xab9   :  { %1928 = vrot.lane.b32.xlu0 %v1901_v1, %s2466_s9  ;;  %v1920_v56 = vmul.f32 %v1901_v1, %v2831_v12 }
 0xabb   :  { %v2370_v5 = vpop.f32.mrb[26].mxu0 }
 0xabc   :  { %1934 = vrot.lane.b32.xlu1 %v2370_v5, %s2466_s9  ;;  %v1911_v15 = vpop.f32.mrb[27].mxu0  ;;  %v1923_v42 = vmul.f32 %v2370_v5, %v2835_v21 }
 0xabd   :  { %1932 = vrot.lane.b32.xlu0 %v1911_v15, %s2466_s9  ;;  %v1922_v8 = vmul.f32 %v1911_v15, %v2837_v23 }
 0xb2a   :  { %v1931_v52 = vpop.permute.xlu1 %1930 }
 0xb2b   :  { %v1941_v54 = vadd.f32 %v1931_v52, %v1921_v55  ;;  %v1929_v58 = vpop.permute.xlu0 %1928 }
 0xb2c   :  { %v1940_v30 = vadd.f32 %v1929_v58, %v1920_v56 }
 0xb2d   :  { %v1945_v60 = vmin.f32 %v1941_v54, 20.0 }
 0xb2e   :  { %v1944_v9 = vmin.f32 %v1940_v30, 20.0  ;;  %v1935_v11 = vpop.permute.xlu1 %1934 }
 0xb2f   :  { %v1950_v14 = vmul.f32 1.442695, %v1945_v60  ;;  %v1943_v16 = vadd.f32 %v1935_v11, %v1923_v42  ;;  %v1933_v17 = vpop.permute.xlu0 %1932 }
 0xb30   :  { %v1948_v25 = vmul.f32 1.442695, %v1944_v9  ;;  %v1942_v28 = vadd.f32 %v1933_v17, %v1922_v8 }
 0xb31   :  { %2444 = vpow2.f32 %v1950_v14  ;;  %v1947_v20 = vmin.f32 %v1943_v16, 20.0 }
 0xb32   :  { %2446 = vpow2.f32 %v1948_v25  ;;  %v1946_v12 = vmin.f32 %v1942_v28, 20.0 }
 0xb33   :  { %v1954_v29 = vmul.f32 1.442695, %v1947_v20 }
 0xb34   :  { %v1952_v31 = vmul.f32 1.442695, %v1946_v12 }
 0xb35   :  { %2448 = vpow2.f32 %v1954_v29 }
 0xb36   :  { %2450 = vpow2.f32 %v1952_v31 }
 0xb3b   :  { %v2445_v32 = vpop.eup %2444 }
 0xb3c   :  { %v2447_v21 = vpop.eup %2446  ;;  %v1957_v33 = vadd.f32 2.0, %v2445_v32 }
 0xb3d   :  { %v1956_v34 = vadd.f32 2.0, %v2447_v21 }
 0xb3e   :  { %v1961_v23 = vmul.f32 %v2445_v32, %v1957_v33 }
 0xb3f   :  { %v2449_v35 = vpop.eup %2448  ;;  %v1960_v36 = vmul.f32 %v2447_v21, %v1956_v34 }
 0xb40   :  { %v2451_v57 = vpop.eup %2450  ;;  %v1965_v18 = vadd.f32 2.0, %v1961_v23  ;;  %v1959_v62 = vadd.f32 2.0, %v2449_v35 }
 0xb41   :  { %v1964_v0 = vadd.f32 2.0, %v1960_v36  ;;  %v1958_v39 = vadd.f32 2.0, %v2451_v57 }
 0xb42   :  { %2452 = vrcp.f32 %v1965_v18  ;;  %v1963_v22 = vmul.f32 %v2449_v35, %v1959_v62 }
 0xb43   :  { %2454 = vrcp.f32 %v1964_v0  ;;  %v1962_v40 = vmul.f32 %v2451_v57, %v1958_v39 }
 0xb44   :  { %v1967_v41 = vadd.f32 2.0, %v1963_v22 }
 0xb45   :  { %v1966_v43 = vadd.f32 2.0, %v1962_v40 }
 0xb46   :  { %2456 = vrcp.f32 %v1967_v41 }
 0xb47   :  { %2458 = vrcp.f32 %v1966_v43 }
 0xb4c   :  { %v2453_v10 = vpop.eup %2452 }
 0xb4d   :  { %v2455_v27 = vpop.eup %2454  ;;  %v1971_v19 = vmul.f32 %v2453_v10, %v1961_v23 }
 0xb4e   :  { %v1969_v63 = vmul.f32 %v2455_v27, %v1960_v36 }
 0xb4f   :  { %v1977_v37 = vmul.f32 %v1971_v19, %v1941_v54 }
 0xb50   :  { %v2457_v38 = vpop.eup %2456  ;;  %v1976_v45 = vmul.f32 %v1969_v63, %v1940_v30 }
 0xb51   :  { %v2459_v13 = vpop.eup %2458  ;;  %v1975_v6 = vmul.f32 %v2457_v38, %v1963_v22  ;;  %v2082_v46 = vadd.f32 %v2068_v61, %v1977_v37 }
 0xb52   :  { %v1973_v2 = vmul.f32 %v2459_v13, %v1962_v40  ;;  %v2081_v48 = vadd.f32 %v2063_v44, %v1976_v45 }
 0xb53   :  { %v1979_v7 = vmul.f32 %v1975_v6, %v1943_v16  ;;  %2086 = vst.msk [vmem:[%s2943_s10 + $0x8] sm:$0xff] %vm187_vm9, %v2082_v46 }
 0xb54   :  { %v1978_v59 = vmul.f32 %v1973_v2, %v1942_v28  ;;  %2085 = vst.msk [vmem:[%s2943_s10] sm:$0xff] %vm187_vm9, %v2081_v48 }
 0xb55   :  { %v2084_v3 = vadd.f32 %v2078_v47, %v1979_v7 }
 0xb56   :  { %v2083_v1 = vadd.f32 %v2073_v4, %v1978_v59 }
 0xb57   :  { %2088 = vst.msk [vmem:[%s2943_s10 + $0x18] sm:$0xff] %vm187_vm9, %v2084_v3 }
 0xb58   :  { %2087 = vst.msk [vmem:[%s2943_s10 + $0x10] sm:$0xff] %vm187_vm9, %v2083_v1 }

</bundles_post_ra>
